<compile_context>
chip_gen: v6e
topology: v6e:2x2x1
jax: 0.10.0
libtpu: 0.0.40
codegen_flags: <defaults>
</compile_context>

<pallas_src>
import functools

import jax
import jax.numpy as jnp
from jax.experimental import pallas as pl
from jax.experimental.pallas import tpu as pltpu


def _leaky_relu(x, slope=0.1):
    return jnp.where(x > 0, x, slope * x)


def _gcn_layer(A, H, W, b):
    """f32 result of (A @ H) @ W + b, re-associated to the cheaper ordering.

    A, H, W are bf16 (MXU operands); accumulation and the bias add are f32.
    """
    if W.shape[1] <= H.shape[1]:
        # out-dim <= in-dim: shrink the RHS lane width before the (GN x GN) A-matmul.
        t = jnp.dot(H, W, preferred_element_type=jnp.float32).astype(jnp.bfloat16)
        z = jnp.dot(A, t, preferred_element_type=jnp.float32)
    else:
        t = jnp.dot(A, H, preferred_element_type=jnp.float32).astype(jnp.bfloat16)
        z = jnp.dot(t, W, preferred_element_type=jnp.float32)
    return z + b  # b is f32 -> f32 elementwise


def _make_kernel(dim_out):
    def kernel(a_ref, x_ref, w1_ref, b1_ref, w2_ref, b2_ref, w3_ref, b3_ref, out_ref):
        A = a_ref[0]                      # (GN, GN) bf16 block-diagonal adjacency
        X = x_ref[0]                      # (GN, dim_in) bf16 stacked node features

        # layer 1: leaky_relu( (A @ X) @ W1 + b1 )
        h = _leaky_relu(_gcn_layer(A, X, w1_ref[...], b1_ref[...]))
        # layer 2: leaky_relu( A @ (h @ W2) + b2 )   (re-associated, same math)
        h = _leaky_relu(_gcn_layer(A, h.astype(jnp.bfloat16), w2_ref[...], b2_ref[...]))
        # layer 3: A @ (h @ W3) + b3   (W3/b3 lane-padded to 128 cols)
        z = _gcn_layer(A, h.astype(jnp.bfloat16), w3_ref[...], b3_ref[...])

        # Mask the padded lanes out of the softmax, then softmax over the feature axis
        # (matches torch.softmax(X, dim=1)); exact divide so rows sum to 1.
        col = jax.lax.broadcasted_iota(jnp.int32, z.shape, 1)
        z = jnp.where(col < dim_out, z, jnp.float32(-1e30))
        m = jnp.max(z, axis=1, keepdims=True)
        e = jnp.exp(z - m)
        out_ref[0] = (e / jnp.sum(e, axis=1, keepdims=True)).astype(out_ref.dtype)

    return kernel


def prepare_params(params):
    """One-time prep (outside the per-call jit path): bf16 weights, f32 biases,
    W3/b3 column-padded to a lane-dense 128-multiple."""
    dim_out = int(params["W3"].shape[1])
    out_pad = 128 * ((dim_out + 127) // 128)

    W1 = jnp.asarray(params["W1"], jnp.bfloat16)
    W2 = jnp.asarray(params["W2"], jnp.bfloat16)
    W3p = jnp.zeros((params["W3"].shape[0], out_pad), jnp.bfloat16)
    W3p = W3p.at[:, :dim_out].set(jnp.asarray(params["W3"], jnp.bfloat16))

    b1 = jnp.asarray(params["b1"], jnp.float32).reshape(1, -1)
    b2 = jnp.asarray(params["b2"], jnp.float32).reshape(1, -1)
    b3p = jnp.zeros((1, out_pad), jnp.float32)
    b3p = b3p.at[:, :dim_out].set(jnp.asarray(params["b3"], jnp.float32).reshape(1, -1))

    return {"arrays": (W1, b1, W2, b2, W3p, b3p), "dim_out": dim_out}


@functools.partial(jax.jit, static_argnames=("dim_out", "num_blocks"))
def _gcn3_impl(A, X, W1, b1, W2, b2, W3p, b3p, *, dim_out, num_blocks):
    B, N, _ = A.shape
    nb = num_blocks
    G = B // nb                      # graphs per grid step
    GN = G * N                       # rows per block (MXU M-dim)
    dim_in = X.shape[-1]
    h1, h2, out_pad = W1.shape[1], W2.shape[1], W3p.shape[1]

    # Block-diagonal adjacency per grid step: one 2-D (GN, GN) matmul replaces G tiny
    # per-graph (N, N) matmuls.  bf16 everywhere on the MXU-operand side.
    A16 = A.astype(jnp.bfloat16).reshape(nb, G, N, N)
    eye = jnp.eye(G, dtype=jnp.bfloat16)
    A_bd = jnp.einsum("ngij,gh->ngihj", A16, eye).reshape(nb, GN, GN)
    X16 = X.astype(jnp.bfloat16).reshape(nb, GN, dim_in)

    kernel = _make_kernel(dim_out)

    flops_per_block = 2 * GN * (GN * dim_in + dim_in * h1 + h1 * h2 + GN * h2
                                + GN * h2 + h2 * out_pad)
    cost = pl.CostEstimate(
        flops=nb * flops_per_block,
        transcendentals=nb * GN * out_pad,                    # exp
        bytes_accessed=(2 * (nb * GN * GN + nb * GN * dim_in)
                        + 2 * (dim_in * h1 + h1 * h2 + h2 * out_pad)
                        + 4 * (h1 + h2 + out_pad)
                        + 4 * nb * GN * out_pad),
    )

    grid_spec = pltpu.PrefetchScalarGridSpec(
        num_scalar_prefetch=0,
        grid=(nb,),
        in_specs=[
            pl.BlockSpec((1, GN, GN), lambda i: (i, 0, 0)),
            pl.BlockSpec((1, GN, dim_in), lambda i: (i, 0, 0)),
            pl.BlockSpec((dim_in, h1), lambda i: (0, 0)),
            pl.BlockSpec((1, h1), lambda i: (0, 0)),
            pl.BlockSpec((h1, h2), lambda i: (0, 0)),
            pl.BlockSpec((1, h2), lambda i: (0, 0)),
            pl.BlockSpec((h2, out_pad), lambda i: (0, 0)),
            pl.BlockSpec((1, out_pad), lambda i: (0, 0)),
        ],
        out_specs=pl.BlockSpec((1, GN, out_pad), lambda i: (i, 0, 0)),
    )

    padded = pl.pallas_call(
        kernel,
        out_shape=jax.ShapeDtypeStruct((nb, GN, out_pad), jnp.float32),
        grid_spec=grid_spec,
        compiler_params=pltpu.CompilerParams(
            dimension_semantics=("parallel",),   # one block per TensorCore on v7x
        ),
        cost_estimate=cost,
    )(A_bd, X16, W1, b1, W2, b2, W3p, b3p)

    # Lane-dense kernel output; layout plumbing (slice) back in the wrapper.
    return padded.reshape(B, N, out_pad)[:, :, :dim_out]


def gcn3_forward(A, X, prepared):
    """A: (B, N, N) or (N, N) row-normalized adjacency; X: (..., N, dim_in)."""
    single = A.ndim == 2
    if single:
        A, X = A[None], X[None]
    B = A.shape[0]
    num_blocks = 2 if (B % 2 == 0 and B >= 2) else 1
    out = _gcn3_impl(A.astype(jnp.float32), X.astype(jnp.float32),
                     *prepared["arrays"],
                     dim_out=prepared["dim_out"], num_blocks=num_blocks)
    return out[0] if single else out


def reference_forward(A, X, params):
    """Pure-JAX f32 reference mirroring the PyTorch module (single graph)."""
    def lrelu(x):
        return jnp.where(x > 0, x, 0.1 * x)
    h = lrelu(A @ X @ params["W1"] + params["b1"])
    h = lrelu(A @ h @ params["W2"] + params["b2"])
    h = A @ h @ params["W3"] + params["b3"]
    return jax.nn.softmax(h, axis=1)


def init_params(key, dim_in, h1, h2, dim_out):
    """Deterministic init. Weights stored transposed as (in, out) (=> x @ W)."""
    ks = jax.random.split(key, 6)

    def lin(kw, kb, fan_in, fan_out):
        bound = 1.0 / jnp.sqrt(fan_in)
        W = jax.random.uniform(kw, (fan_in, fan_out), jnp.float32, -bound, bound)
        b = jax.random.uniform(kb, (fan_out,), jnp.float32, -bound, bound)
        return W, b

    W1, b1 = lin(ks[0], ks[1], dim_in, h1)
    W2, b2 = lin(ks[2], ks[3], h1, h2)
    W3, b3 = lin(ks[4], ks[5], h2, dim_out)
    return {"W1": W1, "b1": b1, "W2": W2, "b2": b2, "W3": W3, "b3": b3}


if __name__ == "__main__":
    key = jax.random.PRNGKey(0)
    k_a, k_x, k_p = jax.random.split(key, 3)

    B = 4            # graphs per call (folded into 2 grid steps)
    N = 16           # nodes per graph
    dim_in, hidden1, hidden2, dim_out = 12, 32, 16, 10

    # Row-normalized random dense adjacencies, as the module's A.mm(X) expects.
    A_raw = jax.random.uniform(k_a, (B, N, N), jnp.float32)
    A = A_raw / jnp.sum(A_raw, axis=-1, keepdims=True)
    X = jax.random.normal(k_x, (B, N, dim_in), jnp.float32)

    params = init_params(k_p, dim_in, hidden1, hidden2, dim_out)
    prepared = prepare_params(params)        # one-time prep, outside the jit path

    out = jax.block_until_ready(gcn3_forward(A, X, prepared))
    ref = jax.block_until_ready(
        jax.vmap(lambda a, x: reference_forward(a, x, params))(A, X))

    assert out.shape == (B, N, dim_out)
    # Tolerance reflects bf16 MXU operands (f32 accumulation); softmax divide is exact.
    assert jnp.allclose(out, ref, atol=1e-2), "mismatch vs reference (batched)"

    # also exercise the single-graph convenience path
    out1 = jax.block_until_ready(gcn3_forward(A[0], X[0], prepared))
    assert out1.shape == (N, dim_out)
    assert jnp.allclose(out1, ref[0], atol=1e-2), "mismatch vs reference (single)"

    print("KERNEL_OK")
</pallas_src>

<mosaic_0001>
module attributes {stable_mosaic.version = 11 : i64} {
  func.func @kernel(%arg0: i32, %arg1: memref<1x32x32xbf16, #tpu.memory_space<vmem>>, %arg2: memref<1x32x12xbf16, #tpu.memory_space<vmem>>, %arg3: memref<12x32xbf16, #tpu.memory_space<vmem>>, %arg4: memref<1x32xf32, #tpu.memory_space<vmem>>, %arg5: memref<32x16xbf16, #tpu.memory_space<vmem>>, %arg6: memref<1x16xf32, #tpu.memory_space<vmem>>, %arg7: memref<16x128xbf16, #tpu.memory_space<vmem>>, %arg8: memref<1x128xf32, #tpu.memory_space<vmem>>, %arg9: memref<1x32x128xf32, #tpu.memory_space<vmem>>) attributes {dimension_semantics = [#tpu.dimension_semantics<parallel>], iteration_bounds = array<i64: 2>, scalar_prefetch = 0 : i64, scratch_operands = 0 : i64, tpu.core_type = #tpu.core_type<tc>, window_params = [{transform_indices = @transform_0, window_bounds = array<i64: 1, 32, 32>}, {transform_indices = @transform_1, window_bounds = array<i64: 1, 32, 12>}, {pipeline_mode = #tpu.pipeline_mode<synchronous>, transform_indices = @transform_2, window_bounds = array<i64: 12, 32>}, {pipeline_mode = #tpu.pipeline_mode<synchronous>, transform_indices = @transform_3, window_bounds = array<i64: 1, 32>}, {pipeline_mode = #tpu.pipeline_mode<synchronous>, transform_indices = @transform_4, window_bounds = array<i64: 32, 16>}, {pipeline_mode = #tpu.pipeline_mode<synchronous>, transform_indices = @transform_5, window_bounds = array<i64: 1, 16>}, {pipeline_mode = #tpu.pipeline_mode<synchronous>, transform_indices = @transform_6, window_bounds = array<i64: 16, 128>}, {pipeline_mode = #tpu.pipeline_mode<synchronous>, transform_indices = @transform_7, window_bounds = array<i64: 1, 128>}, {transform_indices = @transform_8, window_bounds = array<i64: 1, 32, 128>}]} {
    %c0 = arith.constant 0 : index
    %c0_0 = arith.constant 0 : index
    %c0_1 = arith.constant 0 : index
    %0 = vector.load %arg1[%c0, %c0_0, %c0_1] : memref<1x32x32xbf16, #tpu.memory_space<vmem>>, vector<1x32x32xbf16>
    %1 = vector.shape_cast %0 : vector<1x32x32xbf16> to vector<32x32xbf16>
    %c0_2 = arith.constant 0 : index
    %c0_3 = arith.constant 0 : index
    %c0_4 = arith.constant 0 : index
    %2 = vector.load %arg2[%c0_2, %c0_3, %c0_4] : memref<1x32x12xbf16, #tpu.memory_space<vmem>>, vector<1x32x12xbf16>
    %3 = vector.shape_cast %2 : vector<1x32x12xbf16> to vector<32x12xbf16>
    %c0_5 = arith.constant 0 : index
    %c0_6 = arith.constant 0 : index
    %4 = vector.load %arg3[%c0_5, %c0_6] : memref<12x32xbf16, #tpu.memory_space<vmem>>, vector<12x32xbf16>
    %c0_7 = arith.constant 0 : index
    %c0_8 = arith.constant 0 : index
    %5 = vector.load %arg4[%c0_7, %c0_8] : memref<1x32xf32, #tpu.memory_space<vmem>>, vector<1x32xf32>
    %cst = arith.constant dense<0.000000e+00> : vector<32x12xf32>
    %6 = tpu.matmul %1, %3, %cst {dimension_numbers = #tpu.dot_dimension_numbers<[1], [0], [0], [1], [0, 0, 1, 1], [], []>} : vector<32x32xbf16>, vector<32x12xbf16>, vector<32x12xf32> -> vector<32x12xf32>
    %7 = arith.truncf %6 : vector<32x12xf32> to vector<32x12xbf16>
    %cst_9 = arith.constant dense<0.000000e+00> : vector<32x32xf32>
    %8 = tpu.matmul %7, %4, %cst_9 {dimension_numbers = #tpu.dot_dimension_numbers<[1], [0], [0], [1], [0, 0, 1, 1], [], []>} : vector<32x12xbf16>, vector<12x32xbf16>, vector<32x32xf32> -> vector<32x32xf32>
    %9 = vector.broadcast %5 : vector<1x32xf32> to vector<32x32xf32>
    %10 = arith.addf %8, %9 : vector<32x32xf32>
    %cst_10 = arith.constant 0.000000e+00 : f32
    %11 = vector.broadcast %cst_10 : f32 to vector<32x32xf32>
    %12 = arith.cmpf ogt, %10, %11 : vector<32x32xf32>
    %cst_11 = arith.constant 1.000000e-01 : f32
    %13 = vector.broadcast %cst_11 : f32 to vector<32x32xf32>
    %14 = arith.mulf %13, %10 : vector<32x32xf32>
    %15 = arith.select %12, %10, %14 : vector<32x32xi1>, vector<32x32xf32>
    %16 = arith.truncf %15 : vector<32x32xf32> to vector<32x32xbf16>
    %c0_12 = arith.constant 0 : index
    %c0_13 = arith.constant 0 : index
    %17 = vector.load %arg5[%c0_12, %c0_13] : memref<32x16xbf16, #tpu.memory_space<vmem>>, vector<32x16xbf16>
    %c0_14 = arith.constant 0 : index
    %c0_15 = arith.constant 0 : index
    %18 = vector.load %arg6[%c0_14, %c0_15] : memref<1x16xf32, #tpu.memory_space<vmem>>, vector<1x16xf32>
    %cst_16 = arith.constant dense<0.000000e+00> : vector<32x16xf32>
    %19 = tpu.matmul %16, %17, %cst_16 {dimension_numbers = #tpu.dot_dimension_numbers<[1], [0], [0], [1], [0, 0, 1, 1], [], []>} : vector<32x32xbf16>, vector<32x16xbf16>, vector<32x16xf32> -> vector<32x16xf32>
    %20 = arith.truncf %19 : vector<32x16xf32> to vector<32x16xbf16>
    %cst_17 = arith.constant dense<0.000000e+00> : vector<32x16xf32>
    %21 = tpu.matmul %1, %20, %cst_17 {dimension_numbers = #tpu.dot_dimension_numbers<[1], [0], [0], [1], [0, 0, 1, 1], [], []>} : vector<32x32xbf16>, vector<32x16xbf16>, vector<32x16xf32> -> vector<32x16xf32>
    %22 = vector.broadcast %18 : vector<1x16xf32> to vector<32x16xf32>
    %23 = arith.addf %21, %22 : vector<32x16xf32>
    %cst_18 = arith.constant 0.000000e+00 : f32
    %24 = vector.broadcast %cst_18 : f32 to vector<32x16xf32>
    %25 = arith.cmpf ogt, %23, %24 : vector<32x16xf32>
    %cst_19 = arith.constant 1.000000e-01 : f32
    %26 = vector.broadcast %cst_19 : f32 to vector<32x16xf32>
    %27 = arith.mulf %26, %23 : vector<32x16xf32>
    %28 = arith.select %25, %23, %27 : vector<32x16xi1>, vector<32x16xf32>
    %29 = arith.truncf %28 : vector<32x16xf32> to vector<32x16xbf16>
    %c0_20 = arith.constant 0 : index
    %c0_21 = arith.constant 0 : index
    %30 = vector.load %arg7[%c0_20, %c0_21] : memref<16x128xbf16, #tpu.memory_space<vmem>>, vector<16x128xbf16>
    %c0_22 = arith.constant 0 : index
    %c0_23 = arith.constant 0 : index
    %31 = vector.load %arg8[%c0_22, %c0_23] : memref<1x128xf32, #tpu.memory_space<vmem>>, vector<1x128xf32>
    %cst_24 = arith.constant dense<0.000000e+00> : vector<32x16xf32>
    %32 = tpu.matmul %1, %29, %cst_24 {dimension_numbers = #tpu.dot_dimension_numbers<[1], [0], [0], [1], [0, 0, 1, 1], [], []>} : vector<32x32xbf16>, vector<32x16xbf16>, vector<32x16xf32> -> vector<32x16xf32>
    %33 = arith.truncf %32 : vector<32x16xf32> to vector<32x16xbf16>
    %cst_25 = arith.constant dense<0.000000e+00> : vector<32x128xf32>
    %34 = tpu.matmul %33, %30, %cst_25 {dimension_numbers = #tpu.dot_dimension_numbers<[1], [0], [0], [1], [0, 0, 1, 1], [], []>} : vector<32x16xbf16>, vector<16x128xbf16>, vector<32x128xf32> -> vector<32x128xf32>
    %35 = vector.broadcast %31 : vector<1x128xf32> to vector<32x128xf32>
    %36 = arith.addf %34, %35 : vector<32x128xf32>
    %37 = tpu.iota {dimensions = array<i32: 1>} : vector<32x128xi32>
    %c10_i32 = arith.constant 10 : i32
    %38 = vector.broadcast %c10_i32 : i32 to vector<32x128xi32>
    %39 = arith.cmpi slt, %37, %38 : vector<32x128xi32>
    %cst_26 = arith.constant -1.000000e+30 : f32
    %40 = vector.broadcast %cst_26 : f32 to vector<32x128xf32>
    %41 = arith.select %39, %36, %40 : vector<32x128xi1>, vector<32x128xf32>
    %cst_27 = arith.constant dense<0xFF800000> : vector<32xf32>
    %42 = vector.multi_reduction <maximumf>, %41, %cst_27 [1] : vector<32x128xf32> to vector<32xf32>
    %43 = vector.shape_cast %42 : vector<32xf32> to vector<32x1xf32>
    %44 = vector.broadcast %43 : vector<32x1xf32> to vector<32x128xf32>
    %45 = arith.subf %41, %44 : vector<32x128xf32>
    %46 = math.exp %45 : vector<32x128xf32>
    %cst_28 = arith.constant dense<0.000000e+00> : vector<32xf32>
    %47 = vector.multi_reduction <add>, %46, %cst_28 [1] : vector<32x128xf32> to vector<32xf32>
    %48 = vector.shape_cast %47 : vector<32xf32> to vector<32x1xf32>
    %49 = vector.broadcast %48 : vector<32x1xf32> to vector<32x128xf32>
    %50 = arith.divf %46, %49 : vector<32x128xf32>
    %c0_29 = arith.constant 0 : index
    %c0_30 = arith.constant 0 : index
    %c0_31 = arith.constant 0 : index
    %51 = vector.load %arg9[%c0_29, %c0_30, %c0_31] : memref<1x32x128xf32, #tpu.memory_space<vmem>>, vector<1x32x128xf32>
    %52 = vector.shape_cast %51 : vector<1x32x128xf32> to vector<32x128xf32>
    %53 = vector.shape_cast %50 : vector<32x128xf32> to vector<1x32x128xf32>
    tpu.vector_store %arg9[%c0_29, %c0_30, %c0_31], %53 {strides = array<i32>} : memref<1x32x128xf32, #tpu.memory_space<vmem>>, vector<1x32x128xf32>,
    return
  }
  func.func @transform_0(%arg0: i32) -> (i32, i32, i32) {
    %c0_i32 = arith.constant 0 : i32
    %c0_i32_0 = arith.constant 0 : i32
    %c0_i32_1 = arith.constant 0 : i32
    return %arg0, %c0_i32, %c0_i32_0 : i32, i32, i32
  }
  func.func @transform_1(%arg0: i32) -> (i32, i32, i32) {
    %c0_i32 = arith.constant 0 : i32
    %c0_i32_0 = arith.constant 0 : i32
    %c0_i32_1 = arith.constant 0 : i32
    return %arg0, %c0_i32, %c0_i32_0 : i32, i32, i32
  }
  func.func @transform_2(%arg0: i32) -> (i32, i32) {
    %c0_i32 = arith.constant 0 : i32
    %c0_i32_0 = arith.constant 0 : i32
    %c0_i32_1 = arith.constant 0 : i32
    return %c0_i32, %c0_i32_0 : i32, i32
  }
  func.func @transform_3(%arg0: i32) -> (i32, i32) {
    %c0_i32 = arith.constant 0 : i32
    %c0_i32_0 = arith.constant 0 : i32
    %c0_i32_1 = arith.constant 0 : i32
    return %c0_i32, %c0_i32_0 : i32, i32
  }
  func.func @transform_4(%arg0: i32) -> (i32, i32) {
    %c0_i32 = arith.constant 0 : i32
    %c0_i32_0 = arith.constant 0 : i32
    %c0_i32_1 = arith.constant 0 : i32
    return %c0_i32, %c0_i32_0 : i32, i32
  }
  func.func @transform_5(%arg0: i32) -> (i32, i32) {
    %c0_i32 = arith.constant 0 : i32
    %c0_i32_0 = arith.constant 0 : i32
    %c0_i32_1 = arith.constant 0 : i32
    return %c0_i32, %c0_i32_0 : i32, i32
  }
  func.func @transform_6(%arg0: i32) -> (i32, i32) {
    %c0_i32 = arith.constant 0 : i32
    %c0_i32_0 = arith.constant 0 : i32
    %c0_i32_1 = arith.constant 0 : i32
    return %c0_i32, %c0_i32_0 : i32, i32
  }
  func.func @transform_7(%arg0: i32) -> (i32, i32) {
    %c0_i32 = arith.constant 0 : i32
    %c0_i32_0 = arith.constant 0 : i32
    %c0_i32_1 = arith.constant 0 : i32
    return %c0_i32, %c0_i32_0 : i32, i32
  }
  func.func @transform_8(%arg0: i32) -> (i32, i32, i32) {
    %c0_i32 = arith.constant 0 : i32
    %c0_i32_0 = arith.constant 0 : i32
    %c0_i32_1 = arith.constant 0 : i32
    return %arg0, %c0_i32, %c0_i32_0 : i32, i32, i32
  }
}

</mosaic_0001>

<bundles_post_ra>
// kernel: _gcn3_impl.1
= control target key start
LH: loop header
LB: loop body
LE: loop exit
PB: predicated region body
PF: predicated region fallthrough
CT: control target
= control target key end

     0   :  { %s1073_s27 = smov 0   ;;  %s1131_s0 = inlined_call_operand.vmem [shape: bf16[2,32,32], index: 0, kind: input, shape index: {}]   ;;  %s1132_s1 = inlined_call_operand.vmem [shape: bf16[2,32,12], index: 1, kind: input, shape index: {}]   ;;  %s1133_s2 = inlined_call_operand.vmem [shape: bf16[12,32], index: 2, kind: input, shape index: {}]   ;;  %s1134_s3 = inlined_call_operand.vmem [shape: f32[1,32], index: 3, kind: input, shape index: {}]   ;;  %s1135_s4 = inlined_call_operand.vmem [shape: bf16[32,16], index: 4, kind: input, shape index: {}]   ;;  %s1136_s5 = inlined_call_operand.vmem [shape: f32[1,16], index: 5, kind: input, shape index: {}]   ;;  %s1137_s6 = inlined_call_operand.vmem [shape: bf16[16,128], index: 6, kind: input, shape index: {}]   ;;  %s1138_s7 = inlined_call_operand.vmem [shape: f32[1,128], index: 7, kind: input, shape index: {}]   ;;  %s1139_s8 = inlined_call_operand.vmem [shape: f32[2,32,128], index: 8, kind: output, shape index: {}]  }
   0x1 LB: > { %s882_s28 = sadd.s32 4294967295, %s1026_s27   ;;  %p886_p0 = scmp.ge.s32.totalorder %s1026_s27, 1  ;;  %s1026_s27 = sphi %s1073_s27, %s18_s27  }
   0x2   : > { %p272_p1 = scmp.lt.s32.totalorder %s1026_s27, 3 }
   0x4   : > { %p273_p2 = pnand %p886_p0, %p272_p1 }
   0x5   : > { %p311_p3 = scmp.lt.s32.totalorder (!%p273_p2), %s882_s28, 1 }
   0x6   : > { %276 = sbr.rel (%p273_p2) target bundleno = 1570 (0x622), region = 52 }
   0xb   : > { %s1141_s28 = smov (!%p311_p3, %s882_s28), 1  ;;  %vm360_vm0 = vcmask 261120   ;;  %v1000_v4 = vld [vmem:[%s1133_s2] sm:$0x3f]   ;;  %vm436_vm1 = vcmask 1045504   ;;  %vm429_vm2 = vcmask 97280  }
   0xc   : > { %s918_s29 = sshll.u32 %s1141_s28, 4  ;;  %987 = vmatprep.subr.msk.bf16.mxu1 %vm436_vm1, %v1000_v4  ;;  %v438_v5 = vsel %vm436_vm1, %v1000_v4, 0  ;;  %v1001_v12 = vld [vmem:[%s1135_s4 + $0x8] sm:$0xff]   ;;  %v1002_v13 = vld [vmem:[%s1135_s4] sm:$0xff]   ;;  %vm712_vm11 = vcmask 130048   ;;  %s920_s30 = sshll.u32 %s1141_s28, 5 }
   0xd   : > { %s315_s10 = scalar_lea.vmem %s1131_s0, %s918_s29  ;;  %s320_s13 = scalar_lea.vmem %s1132_s1, %s918_s29  ;;  %952 = vmatpush3.bf16.msra.mxu1 %v438_v5  ;;  %v899_v15 = vld [vmem:[%s1134_s3] ss:$0 sm:$0xff] }
   0xe   : > { %v996_v0 = vld [vmem:[%s320_s13 + $0x8] sm:$0xff]   ;;  %v997_v1 = vld [vmem:[%s320_s13] sm:$0xff]   ;;  %957 = vmatprep.subr.bf16.mxu1 %v1001_v12  ;;  %s325_s11 = scalar_lea.vmem %s1139_s8, %s920_s30 }
   0xf   : > { %943 = vmatprep.subr.bf16.mxu0 %v996_v0  ;;  %v998_v2 = vld [vmem:[%s315_s10] sm:$0xff]   ;;  %v1091_v3 = vld [vmem:[%s315_s10 + $0x8] sm:$0xff]  }
  0x10   : > { %944 = vmatpush3.bf16.msra.mxu0 %v996_v0  ;;  %947 = vmatprep.mubr.msk.bf16.mxu0 %vm360_vm0, %v998_v2  ;;  %v907_v39 = vld [vmem:[%s1136_s5] ss:$0 sm:$0xff] }
  0x11   : > { %945 = vmatprep.subr.bf16.mxu0 %v997_v1  ;;  %v1003_v58 = vld [vmem:[%s1137_s6] sm:$0xff]  }
  0x14   : > { %946 = vmatpush3.bf16.msra.mxu0 %v997_v1  ;;  %v768_v1 = vlaneseq }
  0x17   : > { %948 = vmatmul.mubr.msk.bf16.vlgmr.msra.gmra.mxu0 %vm360_vm0, %v1091_v3 }
  0x18   : > { %969 = vmatprep.mubr.msk.bf16.mxu0 %vm360_vm0, %v998_v2 }
  0xd7   : > { %v949_v6 = vpop.f32.mrf.mxu0 }
  0xd9   : > { %v401_v7 = vpop.f32.mrf.mxu0 }
  0xdb   : > { %v950_v8 = vpop.f32.mrf.mxu0 }
  0xdc   : > { %v417_v11 = vpack.c.bf16 %v950_v8, %v949_v6 }
  0xdd   : > { %v404_v9 = vpop.f32.mrf.mxu0 }
  0xde   : > { %v416_v10 = vpack.c.bf16 %v404_v9, %v401_v7 }
  0xe0   : > { %953 = vmatprep.mubr.msk.bf16.mxu1 %vm429_vm2, %v416_v10 }
  0xe1   : > { %954 = vmatmul.mubr.msk.bf16.vlgmr.msra.gmra.mxu1 %vm429_vm2, %v417_v11 }
  0xe2   : > { %958 = vmatpush3.bf16.msra.mxu1 %v1001_v12 }
  0xe3   : > { %959 = vmatprep.subr.bf16.mxu1 %v1002_v13 }
  0xe6   : > { %960 = vmatpush3.bf16.msra.mxu1 %v1002_v13 }
 0x1a1   : > { %v955_v14 = vpop.f32.mrf.mxu1 }
 0x1a2   : > { %v483_v18 = vadd.f32 %v955_v14, %v899_v15 }
 0x1a3   : > { %v474_v16 = vpop.f32.mrf.mxu1 }
 0x1a4   : > { %v475_v17 = vadd.f32 %v899_v15, %v474_v16  ;;  %v495_v25 = vmul.f32 0.1, %v483_v18  ;;  %vm491_vm5 = vcmp.gt.f32.partialorder %v483_v18, 0.0 }
 0x1a5   : > { %v956_v19 = vpop.f32.mrf.mxu1 }
 0x1a6   : > { %v486_v20 = vadd.f32 %v956_v19, %v899_v15  ;;  %v493_v22 = vmul.f32 0.1, %v475_v17  ;;  %vm489_vm4 = vcmp.gt.f32.partialorder %v475_v17, 0.0  ;;  %v499_v30 = vsel %vm491_vm5, %v483_v18, %v495_v25 }
 0x1a7   : > { %v477_v21 = vpop.f32.mrf.mxu1 }
 0x1a8   : > { %vm492_vm3 = vcmp.gt.f32.partialorder %v486_v20, 0.0  ;;  %v496_v23 = vmul.f32 0.1, %v486_v20  ;;  %v478_v24 = vadd.f32 %v899_v15, %v477_v21  ;;  %v497_v28 = vsel %vm489_vm4, %v475_v17, %v493_v22 }
 0x1aa   : > { %vm490_vm6 = vcmp.gt.f32.partialorder %v478_v24, 0.0  ;;  %v494_v26 = vmul.f32 0.1, %v478_v24  ;;  %v500_v27 = vsel %vm492_vm3, %v486_v20, %v496_v23 }
 0x1ab   : > { %v502_v32 = vpack.c.bf16 %v500_v27, %v499_v30 }
 0x1ac   : > { %v498_v29 = vsel %vm490_vm6, %v478_v24, %v494_v26 }
 0x1ad   : > { %v501_v31 = vpack.c.bf16 %v498_v29, %v497_v28 }
 0x1af   : > { %961 = vmatprep.mubr.msk.bf16.mxu1 %vm360_vm0, %v501_v31 }
 0x1b0   : > { %962 = vmatmul.mubr.msk.bf16.vlgmr.msra.gmra.mxu1 %vm360_vm0, %v502_v32 }
 0x1b1   : > { %977 = vmatprep.mubr.msk.bf16.mxu1 %vm360_vm0, %v998_v2  ;;  %v769_v2 = vand.u32 127, %v768_v1 }
 0x1b3   : > { %vm770_vm12 = vcmp.lt.s32.totalorder %v769_v2, 10 }
 0x270   : > { %v963_v33 = vpop.f32.mrf.mxu1 }
 0x272   : > { %v560_v34 = vpop.f32.mrf.mxu1 }
 0x274   : > { %v964_v35 = vpop.f32.mrf.mxu1 }
 0x275   : > { %v576_v36 = vpack.c.bf16 %v964_v35, %v963_v33 }
 0x276   : > { %v563_v37 = vpop.f32.mrf.mxu1 }
 0x277   : > { %v575_v38 = vpack.c.bf16 %v563_v37, %v560_v34  ;;  %965 = vmatprep.subr.bf16.mxu0 %v576_v36 }
 0x278   : > { %966 = vmatpush3.bf16.msra.mxu0 %v576_v36 }
 0x279   : > { %967 = vmatprep.subr.bf16.mxu0 %v575_v38 }
 0x27c   : > { %968 = vmatpush3.bf16.msra.mxu0 %v575_v38 }
 0x27d   : > { %981 = vmatprep.subr.bf16.mxu0 %v1003_v58 }
 0x27f   : > { %970 = vmatmul.mubr.msk.bf16.vlgmr.msra.gmra.mxu0 %vm360_vm0, %v1091_v3 }
 0x280   : > { %982 = vmatpush3.bf16.msra.mxu0 %v1003_v58 }
 0x33f   : > { %v971_v40 = vpop.f32.mrf.mxu0 }
 0x340   : > { %v626_v41 = vadd.f32 %v971_v40, %v907_v39 }
 0x341   : > { %v617_v42 = vpop.f32.mrf.mxu0 }
 0x342   : > { %v618_v43 = vadd.f32 %v907_v39, %v617_v42  ;;  %v638_v45 = vmul.f32 0.1, %v626_v41  ;;  %vm634_vm7 = vcmp.gt.f32.partialorder %v626_v41, 0.0 }
 0x343   : > { %v972_v44 = vpop.f32.mrf.mxu0 }
 0x344   : > { %v629_v46 = vadd.f32 %v972_v44, %v907_v39  ;;  %v636_v48 = vmul.f32 0.1, %v618_v43  ;;  %vm632_vm9 = vcmp.gt.f32.partialorder %v618_v43, 0.0  ;;  %v642_v52 = vsel %vm634_vm7, %v626_v41, %v638_v45 }
 0x345   : > { %v620_v47 = vpop.f32.mrf.mxu0 }
 0x346   : > { %vm635_vm8 = vcmp.gt.f32.partialorder %v629_v46, 0.0  ;;  %v639_v49 = vmul.f32 0.1, %v629_v46  ;;  %v621_v50 = vadd.f32 %v907_v39, %v620_v47  ;;  %v640_v55 = vsel %vm632_vm9, %v618_v43, %v636_v48 }
 0x348   : > { %vm633_vm10 = vcmp.gt.f32.partialorder %v621_v50, 0.0  ;;  %v637_v51 = vmul.f32 0.1, %v621_v50  ;;  %v643_v53 = vsel %vm635_vm8, %v629_v46, %v639_v49 }
 0x349   : > { %v645_v54 = vpack.c.bf16 %v643_v53, %v642_v52 }
 0x34a   : > { %v641_v56 = vsel %vm633_vm10, %v621_v50, %v637_v51 }
 0x34b   : > { %973 = vmatprep.subr.bf16.mxu1 %v645_v54  ;;  %v644_v57 = vpack.c.bf16 %v641_v56, %v640_v55 }
 0x34c   : > { %974 = vmatpush3.bf16.msra.mxu1 %v645_v54 }
 0x34d   : > { %975 = vmatprep.subr.bf16.mxu1 %v644_v57 }
 0x350   : > { %976 = vmatpush3.bf16.msra.mxu1 %v644_v57 }
 0x353   : > { %978 = vmatmul.mubr.msk.bf16.vlgmr.msra.gmra.mxu1 %vm360_vm0, %v1091_v3  ;;  %v912_v3 = vld [vmem:[%s1138_s7] ss:$0 sm:$0xff] }
 0x413   : > { %v979_v59 = vpop.f32.mrf.mxu1 }
 0x415   : > { %v683_v60 = vpop.f32.mrf.mxu1 }
 0x417   : > { %v980_v61 = vpop.f32.mrf.mxu1 }
 0x418   : > { %v699_v0 = vpack.c.bf16 %v980_v61, %v979_v59 }
 0x419   : > { %v686_v62 = vpop.f32.mrf.mxu1 }
 0x41a   : > { %v698_v63 = vpack.c.bf16 %v686_v62, %v683_v60 }
 0x41c   : > { %983 = vmatprep.mubr.msk.bf16.mxu0 %vm712_vm11, %v698_v63 }
 0x41d   : > { %984 = vmatmul.mubr.msk.bf16.vlgmr.msra.gmra.mxu0 %vm712_vm11, %v699_v0 }
 0x4dd   : > { %v985_v4 = vpop.f32.mrf.mxu0 }
 0x4de   : > { %v762_v5 = vadd.f32 %v985_v4, %v912_v3 }
 0x4df   : > { %v753_v6 = vpop.f32.mrf.mxu0 }
 0x4e0   : > { %v754_v7 = vadd.f32 %v912_v3, %v753_v6  ;;  %v773_v8 = vsel %vm770_vm12, %v762_v5, -1e+30 }
 0x4e1   : > { %779 = vmax.xlane.f32.xlu1 %v773_v8  ;;  %v986_v9 = vpop.f32.mrf.mxu0 }
 0x4e2   : > { %v765_v10 = vadd.f32 %v986_v9, %v912_v3  ;;  %v771_v11 = vsel %vm770_vm12, %v754_v7, -1e+30 }
 0x4e3   : > { %v756_v12 = vpop.f32.mrf.mxu0  ;;  %775 = vmax.xlane.f32.xlu0 %v771_v11 }
 0x4e4   : > { %v757_v13 = vadd.f32 %v912_v3, %v756_v12  ;;  %v774_v14 = vsel %vm770_vm12, %v765_v10, -1e+30 }
 0x4e5   : > { %781 = vmax.xlane.f32.xlu1 %v774_v14 }
 0x4e6   : > { %v772_v15 = vsel %vm770_vm12, %v757_v13, -1e+30 }
 0x4e7   : > { %777 = vmax.xlane.f32.xlu0 %v772_v15 }
 0x56a   : > { %v780_v16 = vpop.xlane.xlu1 %779 }
 0x56b   : > { %v785_v17 = vsub.f32 %v773_v8, %v780_v16 }
 0x56c   : > { %v776_v18 = vpop.xlane.xlu0 %775 }
 0x56d   : > { %v783_v19 = vsub.f32 %v771_v11, %v776_v18  ;;  %v791_v22 = vmul.f32 1.442695, %v785_v17 }
 0x56e   : > { %v782_v20 = vpop.xlane.xlu1 %781 }
 0x56f   : > { %v787_v21 = vmul.f32 1.442695, %v783_v19  ;;  %v786_v24 = vsub.f32 %v774_v14, %v782_v20 }
 0x570   : > { %v778_v23 = vpop.xlane.xlu0 %777 }
 0x571   : > { %1004 = vpow2.f32 %v787_v21  ;;  %v784_v25 = vsub.f32 %v772_v15, %v778_v23  ;;  %v793_v27 = vmul.f32 1.442695, %v786_v24 }
 0x572   : > { %1006 = vpow2.f32 %v791_v22 }
 0x573   : > { %v789_v26 = vmul.f32 1.442695, %v784_v25 }
 0x575   : > { %1008 = vpow2.f32 %v789_v26 }
 0x576   : > { %1010 = vpow2.f32 %v793_v27 }
 0x57e   : > { %v1005_v28 = vpop.eup %1004 }
 0x57f   : > { %795 = vadd.xlane.f32.xlu0 %v1005_v28  ;;  %v1007_v29 = vpop.eup %1006 }
 0x582   : > { %v1009_v30 = vpop.eup %1008 }
 0x583   : > { %799 = vadd.xlane.f32.xlu0 %v1007_v29  ;;  %797 = vadd.xlane.f32.xlu1 %v1009_v30  ;;  %v1011_v31 = vpop.eup %1010 }
 0x587   : > { %801 = vadd.xlane.f32.xlu1 %v1011_v31 }
 0x608   : > { %v796_v32 = vpop.xlane.xlu0 %795 }
 0x609   : > { %1012 = vrcp.f32 %v796_v32 }
 0x60c   : > { %v798_v33 = vpop.xlane.xlu1 %797  ;;  %v800_v34 = vpop.xlane.xlu0 %799 }
 0x60d   : > { %1014 = vrcp.f32 %v798_v33 }
 0x60e   : > { %1016 = vrcp.f32 %v800_v34 }
 0x610   : > { %v802_v35 = vpop.xlane.xlu1 %801 }
 0x611   : > { %1018 = vrcp.f32 %v802_v35 }
 0x616   : > { %v1013_v36 = vpop.eup %1012 }
 0x617   : > { %v804_v37 = vmul.f32 %v1013_v36, %v1005_v28 }
 0x619   : > { %811 = vst [vmem:[%s325_s11] sm:$0xff] %v804_v37 }
 0x61a   : > { %v1015_v38 = vpop.eup %1014 }
 0x61b   : > { %v1017_v39 = vpop.eup %1016  ;;  %v806_v40 = vmul.f32 %v1015_v38, %v1009_v30 }
 0x61c   : > { %v808_v41 = vmul.f32 %v1017_v39, %v1007_v29 }
 0x61d   : > { %812 = vst [vmem:[%s325_s11 + $0x8] sm:$0xff] %v806_v40 }
 0x61e   : > { %v1019_v42 = vpop.eup %1018  ;;  %813 = vst [vmem:[%s325_s11 + $0x10] sm:$0xff] %v808_v41 }
 0x61f   : > { %v810_v43 = vmul.f32 %v1019_v42, %v1011_v31 }
 0x621   : > { %814 = vst [vmem:[%s325_s11 + $0x18] sm:$0xff] %v810_v43 }
 0x622 PF: > { %s18_s27 = sadd.s32 1, %s1026_s27  }
 0x623   : > { %p15_p4 = scmp.ge.s32.totalorder %s18_s27, 4  }
 0x625   :  { %17 = sbr.rel (!%p15_p4) target bundleno = 1 (0x1), region = 85 }

</bundles_post_ra>
